<compile_context>
chip_gen: v7x
topology: tpu7x:2x2x1
jax: 0.10.0
libtpu: 0.0.40
codegen_flags: <defaults>
</compile_context>

<pallas_src>
import functools

import jax
import jax.numpy as jnp
from jax.experimental import pallas as pl
from jax.experimental.pallas import tpu as pltpu

_LANES = 128


def _round_down(x, m):
    return (x // m) * m


def _cdiv(a, b):
    return -(-a // b)


def _num_tensorcores():
    """Best-effort TensorCores-per-chip (v7x: 2, v5e/v6e: 1). Safe fallback 1."""
    try:
        info = pltpu.get_tpu_info()
    except Exception:
        return 1
    for name in ("num_cores", "core_count", "num_tensorcores", "tensorcore_count"):
        val = getattr(info, name, None)
        if isinstance(val, int) and val > 0:
            return val
    return 1


def _l2loss_kernel(yhat_ref, y_ref, sq_ref, sum_ref, *, tile_rows,
                   blocks_per_chunk, blocks_total, tail_block_rows,
                   has_dup_blocks):
    c = pl.program_id(0)   # chunk (parallel; shards across TCs where supported)
    b = pl.program_id(1)   # block within chunk (reduction axis)

    # Zero the resident (1, 8, 128) accumulators at the start of each chunk.
    @pl.when(b == 0)
    def _():
        sq_ref[...] = jnp.zeros_like(sq_ref)
        sum_ref[...] = jnp.zeros_like(sum_ref)

    groups = tile_rows // 8

    def accumulate(valid_rows_in_tile):
        yhat = yhat_ref[...].astype(jnp.float32)
        y = y_ref[...].astype(jnp.float32)
        diff = yhat - y
        sq = diff * diff
        yh = yhat
        if valid_rows_in_tile is not None:
            # Only the ragged tail block pays for the mask.
            row = jax.lax.broadcasted_iota(jnp.int32, (tile_rows, _LANES), 0)
            mask = row < valid_rows_in_tile
            sq = jnp.where(mask, sq, 0.0)
            yh = jnp.where(mask, yh, 0.0)
        # Fold into vreg-shaped accumulators: pure VPU adds, no cross-lane
        # reduce in the hot loop.
        sq_ref[...] += sq.reshape(1, groups, 8, _LANES).sum(axis=1)
        sum_ref[...] += yh.reshape(1, groups, 8, _LANES).sum(axis=1)

    has_row_tail = tail_block_rows is not None

    if not has_row_tail and not has_dup_blocks:
        # Every block is full and valid: unconditional, mask-free path.
        accumulate(None)
        return

    logical_block = c * blocks_per_chunk + b
    last_block = blocks_total - 1
    full_limit = last_block if has_row_tail else blocks_total

    if full_limit > 0:
        @pl.when(logical_block < full_limit)
        def _():
            accumulate(None)            # mask-free steady state

    if has_row_tail:
        @pl.when(logical_block == last_block)
        def _():
            accumulate(tail_block_rows)  # masked ragged tail block

    # logical_block >= blocks_total (duplicated clamped blocks from an uneven
    # chunk split) are skipped entirely and contribute exactly zero.


def _l2loss_partial_pallas(yhat2, y2, *, target_block_bytes):
    """Returns (sum((yhat-y)^2), sum(yhat)) over a (rows, 128) slab, in f32."""
    rows = yhat2.shape[0]
    item_a = jnp.dtype(yhat2.dtype).itemsize
    item_b = jnp.dtype(y2.dtype).itemsize
    # Sublane packing for the block's second-to-last dim (8 f32 / 16 bf16 / 32 i8).
    packing = max(8, 32 // min(item_a, item_b))

    # Size the block by bytes (~target_block_bytes per input block).
    target_rows = max(
        packing,
        _round_down(target_block_bytes // (_LANES * max(item_a, item_b)), packing))
    tile_rows = max(packing, min(target_rows, _round_down(rows, packing)))

    blocks_total = _cdiv(rows, tile_rows)
    num_chunks = max(1, min(_num_tensorcores(), 2, blocks_total))
    blocks_per_chunk = _cdiv(blocks_total, num_chunks)
    has_dup_blocks = num_chunks * blocks_per_chunk > blocks_total
    has_row_tail = rows % tile_rows != 0
    tail_block_rows = rows - (blocks_total - 1) * tile_rows if has_row_tail else None

    if has_dup_blocks:
        def in_index_map(c, b):
            return (jnp.minimum(c * blocks_per_chunk + b, blocks_total - 1), 0)
    else:
        def in_index_map(c, b):
            return (c * blocks_per_chunk + b, 0)

    kernel = functools.partial(
        _l2loss_kernel,
        tile_rows=tile_rows,
        blocks_per_chunk=blocks_per_chunk,
        blocks_total=blocks_total,
        tail_block_rows=tail_block_rows,
        has_dup_blocks=has_dup_blocks,
    )

    # Stay within the most restrictive default scoped-VMEM budget (v5e ~16 MiB)
    # for small blocks; raise the limit only when the estimated footprint
    # (double-buffered inputs + f32 working tiles) needs it.  32 MiB fits the
    # physical VMEM of every current chip (v7x has 64 MiB per TC).
    input_buf_bytes = 2 * 2 * tile_rows * _LANES * max(item_a, item_b)
    work_bytes = 4 * tile_rows * _LANES * 4
    vmem_estimate = input_buf_bytes + work_bytes + (1 << 20)
    compiler_kwargs = dict(dimension_semantics=("parallel", "arbitrary"))
    if vmem_estimate > (16 << 20):
        compiler_kwargs["vmem_limit_bytes"] = 32 << 20

    n_main = rows * _LANES
    cost = pl.CostEstimate(
        flops=3 * n_main,
        transcendentals=0,
        bytes_accessed=n_main * (item_a + item_b) + 2 * num_chunks * 8 * _LANES * 4,
    )

    sq_parts, sum_parts = pl.pallas_call(
        kernel,
        out_shape=(
            jax.ShapeDtypeStruct((num_chunks, 8, _LANES), jnp.float32),
            jax.ShapeDtypeStruct((num_chunks, 8, _LANES), jnp.float32),
        ),
        grid_spec=pltpu.PrefetchScalarGridSpec(
            num_scalar_prefetch=0,
            grid=(num_chunks, blocks_per_chunk),
            in_specs=[
                pl.BlockSpec((tile_rows, _LANES), in_index_map),
                pl.BlockSpec((tile_rows, _LANES), in_index_map),
            ],
            out_specs=[
                pl.BlockSpec((1, 8, _LANES), lambda c, b: (c, 0, 0)),
                pl.BlockSpec((1, 8, _LANES), lambda c, b: (c, 0, 0)),
            ],
        ),
        compiler_params=pltpu.CompilerParams(**compiler_kwargs),
        cost_estimate=cost,
    )(yhat2, y2)

    return (jnp.sum(sq_parts, dtype=jnp.float32),
            jnp.sum(sum_parts, dtype=jnp.float32))


def l2loss(yhat, y, *, target_block_bytes=2 << 20):
    assert yhat.shape == y.shape, "yHat and y must have identical shapes"
    n_elems = int(yhat.size)
    assert n_elems > 0

    yhat_flat = yhat.reshape(-1)
    y_flat = y.reshape(-1)

    rows = n_elems // _LANES
    item_a = jnp.dtype(yhat.dtype).itemsize
    item_b = jnp.dtype(y.dtype).itemsize
    packing = max(8, 32 // min(item_a, item_b))

    sq_total = jnp.float32(0.0)
    sum_total = jnp.float32(0.0)
    main = 0
    if rows >= packing:
        main = rows * _LANES
        if main == n_elems:
            # Lane-aligned: pure metadata reshape, zero extra HBM traffic.
            yhat2 = yhat_flat.reshape(rows, _LANES)
            y2 = y_flat.reshape(rows, _LANES)
        else:
            # TODO(synk): for lane-unaligned sizes this prefix slice may
            # materialize a copy; a manual-DMA (pl.ANY) path would avoid it.
            yhat2 = yhat_flat[:main].reshape(rows, _LANES)
            y2 = y_flat[:main].reshape(rows, _LANES)
        sq_total, sum_total = _l2loss_partial_pallas(
            yhat2, y2, target_block_bytes=target_block_bytes)

    if main != n_elems:
        # <128-element lane tail (or tiny inputs): fold in with plain JAX.
        yt = yhat_flat[main:].astype(jnp.float32)
        tt = y_flat[main:].astype(jnp.float32)
        sq_total = sq_total + jnp.sum((yt - tt) ** 2, dtype=jnp.float32)
        sum_total = sum_total + jnp.sum(yt, dtype=jnp.float32)

    inv_n = jnp.float32(1.0 / n_elems)
    return sq_total * inv_n + jnp.abs(sum_total * inv_n)


if __name__ == "__main__":
    key = jax.random.PRNGKey(0)
    k1, k2 = jax.random.split(key)
    shape = (2, 4, 16, 16)  # B, C, H, W (flattened inside the wrapper)
    yhat = jax.random.normal(k1, shape, dtype=jnp.float32)
    y = jax.random.normal(k2, shape, dtype=jnp.float32)

    loss = l2loss(yhat, y)
    jax.block_until_ready(loss)

    # Reference check in plain JAX (same math as the PyTorch module).
    ref = jnp.mean((yhat - y) ** 2) + jnp.abs(jnp.mean(yhat))
    assert jnp.allclose(loss, ref, rtol=1e-5, atol=1e-6), (loss, ref)

    print("KERNEL_OK")
</pallas_src>

<mosaic_0001>
module attributes {stable_mosaic.version = 11 : i64} {
  func.func @_l2loss_kernel(%arg0: i32, %arg1: i32, %arg2: memref<16x128xf32, #tpu.memory_space<vmem>>, %arg3: memref<16x128xf32, #tpu.memory_space<vmem>>, %arg4: memref<1x8x128xf32, #tpu.memory_space<vmem>>, %arg5: memref<1x8x128xf32, #tpu.memory_space<vmem>>) attributes {dimension_semantics = [#tpu.dimension_semantics<parallel>, #tpu.dimension_semantics<arbitrary>], iteration_bounds = array<i64: 1, 1>, scalar_prefetch = 0 : i64, scratch_operands = 0 : i64, tpu.core_type = #tpu.core_type<tc>, window_params = [{transform_indices = @transform_0, window_bounds = array<i64: 16, 128>}, {transform_indices = @transform_1, window_bounds = array<i64: 16, 128>}, {transform_indices = @transform_2, window_bounds = array<i64: 1, 8, 128>}, {transform_indices = @transform_3, window_bounds = array<i64: 1, 8, 128>}]} {
    %c0_i32 = arith.constant 0 : i32
    %0 = arith.cmpi eq, %arg1, %c0_i32 : i32
    %1 = arith.extui %0 : i1 to i32
    %c0_i32_0 = arith.constant 0 : i32
    %2 = arith.cmpi ne, %1, %c0_i32_0 : i32
    scf.if %2 {
      %cst_17 = arith.constant 0.000000e+00 : f32
      %17 = vector.broadcast %cst_17 : f32 to vector<1x8x128xf32>
      %c0_18 = arith.constant 0 : index
      %c0_19 = arith.constant 0 : index
      %c0_20 = arith.constant 0 : index
      %18 = vector.load %arg4[%c0_18, %c0_19, %c0_20] : memref<1x8x128xf32, #tpu.memory_space<vmem>>, vector<1x8x128xf32>
      tpu.vector_store %arg4[%c0_18, %c0_19, %c0_20], %17 {strides = array<i32>} : memref<1x8x128xf32, #tpu.memory_space<vmem>>, vector<1x8x128xf32>,
      %cst_21 = arith.constant 0.000000e+00 : f32
      %19 = vector.broadcast %cst_21 : f32 to vector<1x8x128xf32>
      %c0_22 = arith.constant 0 : index
      %c0_23 = arith.constant 0 : index
      %c0_24 = arith.constant 0 : index
      %20 = vector.load %arg5[%c0_22, %c0_23, %c0_24] : memref<1x8x128xf32, #tpu.memory_space<vmem>>, vector<1x8x128xf32>
      tpu.vector_store %arg5[%c0_22, %c0_23, %c0_24], %19 {strides = array<i32>} : memref<1x8x128xf32, #tpu.memory_space<vmem>>, vector<1x8x128xf32>,
    } else {
    }
    %c0 = arith.constant 0 : index
    %c0_1 = arith.constant 0 : index
    %3 = vector.load %arg2[%c0, %c0_1] : memref<16x128xf32, #tpu.memory_space<vmem>>, vector<16x128xf32>
    %c0_2 = arith.constant 0 : index
    %c0_3 = arith.constant 0 : index
    %4 = vector.load %arg3[%c0_2, %c0_3] : memref<16x128xf32, #tpu.memory_space<vmem>>, vector<16x128xf32>
    %5 = arith.subf %3, %4 : vector<16x128xf32>
    %6 = arith.mulf %5, %5 : vector<16x128xf32>
    %c0_4 = arith.constant 0 : index
    %c0_5 = arith.constant 0 : index
    %c0_6 = arith.constant 0 : index
    %7 = vector.load %arg4[%c0_4, %c0_5, %c0_6] : memref<1x8x128xf32, #tpu.memory_space<vmem>>, vector<1x8x128xf32>
    %8 = vector.shape_cast %6 : vector<16x128xf32> to vector<1x2x8x128xf32>
    %cst = arith.constant dense<0.000000e+00> : vector<1x8x128xf32>
    %9 = vector.multi_reduction <add>, %8, %cst [1] : vector<1x2x8x128xf32> to vector<1x8x128xf32>
    %10 = arith.addf %7, %9 : vector<1x8x128xf32>
    %c0_7 = arith.constant 0 : index
    %c0_8 = arith.constant 0 : index
    %c0_9 = arith.constant 0 : index
    %11 = vector.load %arg4[%c0_7, %c0_8, %c0_9] : memref<1x8x128xf32, #tpu.memory_space<vmem>>, vector<1x8x128xf32>
    tpu.vector_store %arg4[%c0_7, %c0_8, %c0_9], %10 {strides = array<i32>} : memref<1x8x128xf32, #tpu.memory_space<vmem>>, vector<1x8x128xf32>,
    %c0_10 = arith.constant 0 : index
    %c0_11 = arith.constant 0 : index
    %c0_12 = arith.constant 0 : index
    %12 = vector.load %arg5[%c0_10, %c0_11, %c0_12] : memref<1x8x128xf32, #tpu.memory_space<vmem>>, vector<1x8x128xf32>
    %13 = vector.shape_cast %3 : vector<16x128xf32> to vector<1x2x8x128xf32>
    %cst_13 = arith.constant dense<0.000000e+00> : vector<1x8x128xf32>
    %14 = vector.multi_reduction <add>, %13, %cst_13 [1] : vector<1x2x8x128xf32> to vector<1x8x128xf32>
    %15 = arith.addf %12, %14 : vector<1x8x128xf32>
    %c0_14 = arith.constant 0 : index
    %c0_15 = arith.constant 0 : index
    %c0_16 = arith.constant 0 : index
    %16 = vector.load %arg5[%c0_14, %c0_15, %c0_16] : memref<1x8x128xf32, #tpu.memory_space<vmem>>, vector<1x8x128xf32>
    tpu.vector_store %arg5[%c0_14, %c0_15, %c0_16], %15 {strides = array<i32>} : memref<1x8x128xf32, #tpu.memory_space<vmem>>, vector<1x8x128xf32>,
    return
  }
  func.func @transform_0(%arg0: i32, %arg1: i32) -> (i32, i32) {
    %c1_i32 = arith.constant 1 : i32
    %0 = arith.muli %arg0, %c1_i32 : i32
    %1 = arith.addi %0, %arg1 : i32
    %c0_i32 = arith.constant 0 : i32
    %c0_i32_0 = arith.constant 0 : i32
    return %1, %c0_i32 : i32, i32
  }
  func.func @transform_1(%arg0: i32, %arg1: i32) -> (i32, i32) {
    %c1_i32 = arith.constant 1 : i32
    %0 = arith.muli %arg0, %c1_i32 : i32
    %1 = arith.addi %0, %arg1 : i32
    %c0_i32 = arith.constant 0 : i32
    %c0_i32_0 = arith.constant 0 : i32
    return %1, %c0_i32 : i32, i32
  }
  func.func @transform_2(%arg0: i32, %arg1: i32) -> (i32, i32, i32) {
    %c0_i32 = arith.constant 0 : i32
    %c0_i32_0 = arith.constant 0 : i32
    %c0_i32_1 = arith.constant 0 : i32
    return %arg0, %c0_i32, %c0_i32_0 : i32, i32, i32
  }
  func.func @transform_3(%arg0: i32, %arg1: i32) -> (i32, i32, i32) {
    %c0_i32 = arith.constant 0 : i32
    %c0_i32_0 = arith.constant 0 : i32
    %c0_i32_1 = arith.constant 0 : i32
    return %arg0, %c0_i32, %c0_i32_0 : i32, i32, i32
  }
}

</mosaic_0001>

<bundles_post_ra>
// kernel: tpu_custom_call.1
= control target key start
LH: loop header
LB: loop body
LE: loop exit
PB: predicated region body
PF: predicated region fallthrough
CT: control target
= control target key end

     0   :  { %9 = vsyncpa [#allocation3], 0  ;;  %s284_s0 = inlined_call_operand.hbm [shape: f32[16,128], index: 0, kind: input, shape index: {}]   ;;  %s285_s1 = inlined_call_operand.hbm [shape: f32[16,128], index: 1, kind: input, shape index: {}]   ;;  %s286_s2 = inlined_call_operand.hbm [shape: f32[1,8,128], index: 2, kind: output, shape index: {0}]   ;;  %s287_s3 = inlined_call_operand.hbm [shape: f32[1,8,128], index: 3, kind: output, shape index: {1}]  }
   0x1   :  { %10 = vsyncpa [#allocation6], 0 }
   0x2   :  { %11 = vsyncpa [#allocation4], 0 }
   0x3   :  { %12 = vsyncpa [#allocation9], 0  ;;  %s210_s12 = smov [#allocation2]   ;;  %s114_s16 = scalar_lea.hbm %s284_s0, 256 }
   0x4   :  { %s22_s13 = sshll.u32 %s210_s12, 4  ;;  %p115_p0 = scmp.ne.s32.totalorder %s284_s0, %s114_s16  ;;  %s23_s13 = int_to_ptr.vmem [resolvable:$true] %s22_s13 }
   0x5   :  { %p118_p1 = scmp.lt.u32.totalorder %s114_s16, %s284_s0 }
   0x7   :  { %p120_p2 = pnand %p118_p1, %p115_p0 }
   0x9   :  { %123 = shalt.err (!%p120_p2)
}
   0xa   :  { %s124_s21 = scalar_lea.vmem %s23_s13, 256  ;;  %p129_p4 = scmp.lt.s32.totalorder %s23_s13, %s23_s13 }
   0xb   :  { %p125_p3 = scmp.ne.s32.totalorder %s23_s13, %s124_s21  ;;  %p130_p5 = scmp.lt.s32.totalorder %s124_s21, %s124_s21 }
   0xd   :  { %p131_p6 = por %p130_p5, %p129_p4 }
   0xf   :  { %p132_p7 = pnand %p131_p6, %p125_p3 }
  0x11   :  { %135 = shalt.err (!%p132_p7)
}
  0x12   :  { %s211_s22 = smov 128   ;;  %s212_s23 = smov 8  }
  0x13   :  { %28 = dma.hbm_to_vmem [thread:$0]  %s284_s0, 256, %s23_s13, [#allocation3], %s211_s22, %s211_s22, %s212_s23  }
  0x14   :  { %s213_s26 = smov [#allocation5]   ;;  %s136_s30 = scalar_lea.hbm %s285_s1, 256 }
  0x15   :  { %s38_s27 = sshll.u32 %s213_s26, 4  ;;  %p137_p8 = scmp.ne.s32.totalorder %s285_s1, %s136_s30  ;;  %s39_s27 = int_to_ptr.vmem [resolvable:$true] %s38_s27 }
  0x16   :  { %p140_p9 = scmp.lt.u32.totalorder %s136_s30, %s285_s1 }
  0x18   :  { %p142_p10 = pnand %p140_p9, %p137_p8 }
  0x1a   :  { %145 = shalt.err (!%p142_p10)
}
  0x1b   :  { %s146_s8 = scalar_lea.vmem %s39_s27, 256  ;;  %p151_p12 = scmp.lt.s32.totalorder %s39_s27, %s39_s27 }
  0x1c   :  { %p147_p11 = scmp.ne.s32.totalorder %s39_s27, %s146_s8  ;;  %p152_p13 = scmp.lt.s32.totalorder %s146_s8, %s146_s8 }
  0x1e   :  { %p153_p0 = por %p152_p13, %p151_p12 }
  0x20   :  { %p154_p1 = pnand %p153_p0, %p147_p11 }
  0x22   :  { %157 = shalt.err (!%p154_p1)
}
  0x23   :  { %44 = dma.hbm_to_vmem [thread:$0]  %s285_s1, 256, %s39_s27, [#allocation6], %s211_s22, %s211_s22, %s212_s23  }
  0x24   :  { %202 = dma.done.wait [#allocation3], 256  }
  0x25   :  { %203 = vsyncadd [#allocation3], 4294967040 }
  0x26   :  { %204 = dma.done.wait [#allocation6], 256  }
  0x27   :  { %205 = vsyncadd [#allocation6], 4294967040  ;;  %v61_v0 = vld [vmem:[#allocation2] sm:$0xff]  ;;  %v62_v1 = vld [vmem:[#allocation2 + $0x8] sm:$0xff]  ;;  %s214_s10 = smov [#allocation8]   ;;  %s215_s12 = smov [#allocation7]  }
  0x28   :  { %v63_v2 = vld [vmem:[#allocation5] sm:$0xff]  ;;  %s93_s11 = sshll.u32 %s214_s10, 4  ;;  %v64_v3 = vld [vmem:[#allocation5 + $0x8] sm:$0xff]  ;;  %v74_v5 = vadd.f32 %v62_v1, %v61_v0  ;;  %s83_s13 = sshll.u32 %s215_s12, 4  ;;  %s94_s11 = int_to_ptr.vmem [resolvable:$true] %s93_s11  ;;  %s84_s13 = int_to_ptr.vmem [resolvable:$true] %s83_s13 }
  0x29   :  { %v65_v4 = vsub.f32 %v61_v0, %v63_v2  ;;  %v66_v6 = vsub.f32 %v62_v1, %v64_v3  ;;  %s158_s1 = scalar_lea.vmem %s94_s11, 128  ;;  %p163_p3 = scmp.lt.s32.totalorder %s94_s11, %s94_s11 }
  0x2a   :  { %76 = vst [vmem:[#allocation8] sm:$0xff] %v74_v5  ;;  %p159_p2 = scmp.ne.s32.totalorder %s94_s11, %s158_s1  ;;  %p164_p4 = scmp.lt.s32.totalorder %s158_s1, %s158_s1 }
  0x2b   :  { %v67_v7 = vmul.f32 %v65_v4, %v65_v4  ;;  %v68_v8 = vmul.f32 %v66_v6, %v66_v6 }
  0x2c   :  { %p165_p5 = por %p164_p4, %p163_p3 }
  0x2d   :  { %v70_v9 = vadd.f32 %v68_v8, %v67_v7 }
  0x2e   :  { %p166_p6 = pnand %p165_p5, %p159_p2 }
  0x30   :  { %169 = shalt.err (!%p166_p6)
}
  0x31   :  { %s170_s16 = scalar_lea.hbm %s287_s3, 128 }
  0x32   :  { %p171_p7 = scmp.ne.s32.totalorder %s287_s3, %s170_s16  ;;  %p174_p8 = scmp.lt.u32.totalorder %s170_s16, %s287_s3 }
  0x34   :  { %p176_p9 = pnand %p174_p8, %p171_p7 }
  0x36   :  { %179 = shalt.err (!%p176_p9)
}
  0x37   :  { %96 = dma.vmem_to_hbm [thread:$0]  %s94_s11, 128, %s287_s3, [#allocation9]   ;;  %72 = vst [vmem:[#allocation7] sm:$0xff] %v70_v9 }
  0x38   :  { %s180_s23 = scalar_lea.vmem %s84_s13, 128  ;;  %p185_p11 = scmp.lt.s32.totalorder %s84_s13, %s84_s13 }
  0x39   :  { %p181_p10 = scmp.ne.s32.totalorder %s84_s13, %s180_s23  ;;  %p186_p12 = scmp.lt.s32.totalorder %s180_s23, %s180_s23 }
  0x3b   :  { %p187_p13 = por %p186_p12, %p185_p11 }
  0x3d   :  { %p188_p0 = pnand %p187_p13, %p181_p10 }
  0x3f   :  { %191 = shalt.err (!%p188_p0)
}
  0x40   :  { %s192_s26 = scalar_lea.hbm %s286_s2, 128 }
  0x41   :  { %p193_p1 = scmp.ne.s32.totalorder %s286_s2, %s192_s26  ;;  %p196_p2 = scmp.lt.u32.totalorder %s192_s26, %s286_s2 }
  0x43   :  { %p198_p3 = pnand %p196_p2, %p193_p1 }
  0x45   :  { %201 = shalt.err (!%p198_p3)
}
  0x46   :  { %86 = dma.vmem_to_hbm [thread:$0]  %s84_s13, 128, %s286_s2, [#allocation4]  }
  0x47   :  { %206 = dma.done.wait [#allocation4], 128  }
  0x48   :  { %207 = vsyncadd [#allocation4], 4294967168 }
  0x49   :  { %208 = dma.done.wait [#allocation9], 128  }
  0x4a   :  { %209 = vsyncadd [#allocation9], 4294967168 }
  0x4b   :  { %103 = vsyncpa [#allocation3], 1 }
  0x4c   :  { %104 = vsyncpa [#allocation6], 1 }
  0x4d   :  { %105 = vsyncpa [#allocation4], 1 }
  0x4e   :  { %106 = vsyncpa [#allocation9], 1 }

</bundles_post_ra>
